<compile_context>
chip_gen: v7x
topology: tpu7x:2x2x1
jax: 0.10.0
libtpu: 0.0.40
codegen_flags: <defaults>
</compile_context>

<pallas_src>
import functools

import jax
import jax.numpy as jnp
from jax import lax
from jax.experimental import pallas as pl
from jax.experimental.pallas import tpu as pltpu


def _l_exp_kernel(x_ref, o_ref, *, patch_size, mean_val, inv_scale):
    # x_ref: (TB, C, TH, W) input block, native dtype
    # o_ref: (1, 1, 8, 128) per-grid-step partial sum (lane/sublane padded)
    tb, C, th, w = x_ref.shape
    wp = w // patch_size

    # Channel sum via per-channel accumulate: never materializes a full
    # (TB, C, TH, W) f32 copy of the block.
    cs = x_ref[:, 0, :, :].astype(jnp.float32)
    for c in range(1, C):
        cs = cs + x_ref[:, c, :, :].astype(jnp.float32)
    cs = cs.reshape(tb * th, w)                                        # (TB*TH, W)

    # Row pooling BEFORE the column-pool matmul (sum commutes with it):
    # patch_size x fewer MXU pushes.  Groups never straddle images because
    # tile_h % patch_size == 0 (or tile_h == H, which is a multiple of ps).
    rows = (tb * th) // patch_size
    rp = cs.reshape(rows, patch_size, w).sum(axis=1)                   # (rows, W)

    # Column-pooling indicator with 1/(C*ps^2) folded in, built in-kernel on
    # the VPU (saves the awt DMA stream and its two VMEM buffers).
    i = lax.broadcasted_iota(jnp.int32, (w, wp), 0)
    j = lax.broadcasted_iota(jnp.int32, (w, wp), 1)
    awt = jnp.where((i >= j * patch_size) & (i < (j + 1) * patch_size),
                    jnp.float32(inv_scale), jnp.float32(0.0))          # (W, Wp)

    pooled = jnp.dot(rp, awt, preferred_element_type=jnp.float32)      # (rows, Wp)
    diff = pooled - jnp.float32(mean_val)
    partial = jnp.sum(diff * diff)
    o_ref[...] = jnp.zeros(o_ref.shape, jnp.float32) + partial


def _divisors(n):
    return [d for d in range(1, n + 1) if n % d == 0]


def _pick_tiles(B, C, H, W, patch_size, itemsize, target=8 << 20):
    """Choose (TILE_B, TILE_H) so each x block is ~`target` bytes.

    Tiny inputs -> one block.  Big images -> tile over H.  Small images with a
    large batch -> pack several images per block along B (amortizes the fixed
    per-grid-step cost instead of running at a fraction of HBM roofline).
    """
    if B * C * H * W * itemsize <= target:
        return B, H                                      # single grid step

    per_image = C * H * W * itemsize
    if per_image >= target:
        # Big images: one image per block, tile over H.
        sub = {4: 8, 2: 16, 1: 32}.get(itemsize, 8)      # sublane packing
        row_bytes = C * W * itemsize
        cands = [th for th in range(patch_size, H + 1, patch_size) if H % th == 0]
        fits = [th for th in cands if th * row_bytes <= target]
        aligned_fits = [th for th in fits if th % sub == 0]
        if aligned_fits:
            tile_h = max(aligned_fits)
        elif fits:
            tile_h = max(fits)
        else:
            aligned_all = [th for th in cands if th % sub == 0]
            tile_h = min(aligned_all) if aligned_all else min(cands)
        return 1, tile_h

    # Small images, larger batch: keep full H per block, pack images along B.
    fits = [tb for tb in _divisors(B) if tb * per_image <= target]
    tile_b = max(fits)                                   # tb=1 always fits here
    # Mild preference for an even number of grid steps (megacore balance),
    # as long as it doesn't shrink the block by more than 2x.
    if (B // tile_b) % 2 == 1:
        even = [tb for tb in fits if (B // tb) % 2 == 0 and 2 * tb >= tile_b]
        if even:
            tile_b = max(even)
    return tile_b, H


def l_exp_pallas(x, patch_size, mean_val):
    """x: (B, C, H, W). Returns scalar float32, matching L_exp.forward."""
    B, C, H, W = x.shape
    # PyTorch AvgPool2d floors: silently drop remainder rows/cols.
    Hf, Wf = (H // patch_size) * patch_size, (W // patch_size) * patch_size
    assert Hf > 0 and Wf > 0, "input smaller than one pooling window"
    if (Hf, Wf) != (H, W):
        x = x[:, :, :Hf, :Wf]
        H, W = Hf, Wf
    Hp, Wp = H // patch_size, W // patch_size

    itemsize = x.dtype.itemsize
    tile_b, tile_h = _pick_tiles(B, C, H, W, patch_size, itemsize)
    nb, nh = B // tile_b, H // tile_h

    # VMEM budget from the actual working set: 2 double-buffered x blocks +
    # f32 channel-sum scratch (+ generous slack for the tiny awt/pooled/out
    # arrays).  Floor of 32 MiB is safe on every generation.
    block_bytes = tile_b * C * tile_h * W * itemsize
    f32_plane_bytes = tile_b * tile_h * W * 4
    vmem_bytes = int(max(2 * block_bytes + 3 * f32_plane_bytes + (4 << 20),
                         32 << 20))

    kernel = functools.partial(
        _l_exp_kernel,
        patch_size=patch_size,
        mean_val=float(mean_val),
        inv_scale=1.0 / float(C * patch_size * patch_size),
    )

    partials = pl.pallas_call(
        kernel,
        out_shape=jax.ShapeDtypeStruct((nb, nh, 8, 128), jnp.float32),
        grid_spec=pltpu.PrefetchScalarGridSpec(
            num_scalar_prefetch=0,
            grid=(nb, nh),
            in_specs=[
                pl.BlockSpec((tile_b, C, tile_h, W),
                             lambda bi, hi: (bi, 0, hi, 0)),
            ],
            out_specs=pl.BlockSpec((1, 1, 8, 128),
                                   lambda bi, hi: (bi, hi, 0, 0)),
        ),
        compiler_params=pltpu.CompilerParams(
            dimension_semantics=("parallel", "parallel"),
            vmem_limit_bytes=vmem_bytes,
        ),
    )(x)   # x in native dtype; cast happens inside the kernel

    inv_count = 1.0 / float(B * Hp * Wp)
    return jnp.sum(partials[:, :, 0, 0]) * jnp.float32(inv_count)


def l_exp_reference(x, patch_size, mean_val):
    """Pure-JAX reference matching the PyTorch module (AvgPool2d floors)."""
    x = x.astype(jnp.float32)
    B, C, H, W = x.shape
    Hf, Wf = (H // patch_size) * patch_size, (W // patch_size) * patch_size
    x = x[:, :, :Hf, :Wf]
    cm = jnp.mean(x, axis=1)                                       # (B, Hf, Wf)
    pooled = cm.reshape(B, Hf // patch_size, patch_size,
                        Wf // patch_size, patch_size).mean(axis=(2, 4))
    return jnp.mean((pooled - jnp.float32(mean_val)) ** 2)


if __name__ == "__main__":
    patch_size = 4
    mean_val = 0.6

    key = jax.random.PRNGKey(0)
    x = jax.random.uniform(key, (2, 4, 16, 16), dtype=jnp.float32)  # B, C, H, W

    d = l_exp_pallas(x, patch_size, mean_val)
    d = jax.block_until_ready(d)

    d_ref = l_exp_reference(x, patch_size, mean_val)
    assert jnp.allclose(d, d_ref, atol=1e-5, rtol=1e-5), (d, d_ref)

    print("KERNEL_OK")
</pallas_src>

<mosaic_0001>
module attributes {stable_mosaic.version = 11 : i64} {
  func.func @_l_exp_kernel(%arg0: i32, %arg1: i32, %arg2: memref<2x4x16x16xf32, #tpu.memory_space<vmem>>, %arg3: memref<1x1x8x128xf32, #tpu.memory_space<vmem>>) attributes {dimension_semantics = [#tpu.dimension_semantics<parallel>, #tpu.dimension_semantics<parallel>], iteration_bounds = array<i64: 1, 1>, scalar_prefetch = 0 : i64, scratch_operands = 0 : i64, tpu.core_type = #tpu.core_type<tc>, window_params = [{transform_indices = @transform_0, window_bounds = array<i64: 2, 4, 16, 16>}, {transform_indices = @transform_1, window_bounds = array<i64: 1, 1, 8, 128>}]} {
    %c0 = arith.constant 0 : index
    %c0_0 = arith.constant 0 : index
    %c0_1 = arith.constant 0 : index
    %c0_2 = arith.constant 0 : index
    %0 = vector.load %arg2[%c0, %c0_0, %c0_1, %c0_2] : memref<2x4x16x16xf32, #tpu.memory_space<vmem>>, vector<2x1x16x16xf32>
    %1 = vector.shape_cast %0 : vector<2x1x16x16xf32> to vector<2x16x16xf32>
    %c0_3 = arith.constant 0 : index
    %c1 = arith.constant 1 : index
    %c0_4 = arith.constant 0 : index
    %c0_5 = arith.constant 0 : index
    %2 = vector.load %arg2[%c0_3, %c1, %c0_4, %c0_5] : memref<2x4x16x16xf32, #tpu.memory_space<vmem>>, vector<2x1x16x16xf32>
    %3 = vector.shape_cast %2 : vector<2x1x16x16xf32> to vector<2x16x16xf32>
    %4 = arith.addf %1, %3 : vector<2x16x16xf32>
    %c0_6 = arith.constant 0 : index
    %c2 = arith.constant 2 : index
    %c0_7 = arith.constant 0 : index
    %c0_8 = arith.constant 0 : index
    %5 = vector.load %arg2[%c0_6, %c2, %c0_7, %c0_8] : memref<2x4x16x16xf32, #tpu.memory_space<vmem>>, vector<2x1x16x16xf32>
    %6 = vector.shape_cast %5 : vector<2x1x16x16xf32> to vector<2x16x16xf32>
    %7 = arith.addf %4, %6 : vector<2x16x16xf32>
    %c0_9 = arith.constant 0 : index
    %c3 = arith.constant 3 : index
    %c0_10 = arith.constant 0 : index
    %c0_11 = arith.constant 0 : index
    %8 = vector.load %arg2[%c0_9, %c3, %c0_10, %c0_11] : memref<2x4x16x16xf32, #tpu.memory_space<vmem>>, vector<2x1x16x16xf32>
    %9 = vector.shape_cast %8 : vector<2x1x16x16xf32> to vector<2x16x16xf32>
    %10 = arith.addf %7, %9 : vector<2x16x16xf32>
    %11 = vector.shape_cast %10 : vector<2x16x16xf32> to vector<32x16xf32>
    %12 = vector.shape_cast %11 : vector<32x16xf32> to vector<8x4x16xf32>
    %cst = arith.constant dense<0.000000e+00> : vector<8x16xf32>
    %13 = vector.multi_reduction <add>, %12, %cst [1] : vector<8x4x16xf32> to vector<8x16xf32>
    %14 = tpu.iota {dimensions = array<i32: 0>} : vector<16x4xi32>
    %15 = tpu.iota {dimensions = array<i32: 1>} : vector<16x4xi32>
    %c4_i32 = arith.constant 4 : i32
    %16 = vector.broadcast %c4_i32 : i32 to vector<16x4xi32>
    %17 = arith.muli %15, %16 : vector<16x4xi32>
    %18 = arith.cmpi sge, %14, %17 : vector<16x4xi32>
    %c1_i32 = arith.constant 1 : i32
    %19 = vector.broadcast %c1_i32 : i32 to vector<16x4xi32>
    %20 = arith.addi %15, %19 : vector<16x4xi32>
    %c4_i32_12 = arith.constant 4 : i32
    %21 = vector.broadcast %c4_i32_12 : i32 to vector<16x4xi32>
    %22 = arith.muli %20, %21 : vector<16x4xi32>
    %23 = arith.cmpi slt, %14, %22 : vector<16x4xi32>
    %24 = arith.andi %18, %23 : vector<16x4xi1>
    %cst_13 = arith.constant 1.562500e-02 : f32
    %cst_14 = arith.constant 0.000000e+00 : f32
    %25 = vector.broadcast %cst_13 : f32 to vector<16x4xf32>
    %26 = vector.broadcast %cst_14 : f32 to vector<16x4xf32>
    %27 = arith.select %24, %25, %26 : vector<16x4xi1>, vector<16x4xf32>
    %cst_15 = arith.constant dense<0.000000e+00> : vector<8x4xf32>
    %28 = tpu.matmul %13, %27, %cst_15 {dimension_numbers = #tpu.dot_dimension_numbers<[1], [0], [0], [1], [0, 0, 1, 1], [], []>} : vector<8x16xf32>, vector<16x4xf32>, vector<8x4xf32> -> vector<8x4xf32>
    %cst_16 = arith.constant 6.000000e-01 : f32
    %29 = vector.broadcast %cst_16 : f32 to vector<8x4xf32>
    %30 = arith.subf %28, %29 : vector<8x4xf32>
    %31 = arith.mulf %30, %30 : vector<8x4xf32>
    %32 = vector.shape_cast %31 : vector<8x4xf32> to vector<1x8x4xf32>
    %cst_17 = arith.constant dense<0.000000e+00> : vector<1xf32>
    %33 = vector.multi_reduction <add>, %32, %cst_17 [1, 2] : vector<1x8x4xf32> to vector<1xf32>
    %34 = vector.shape_cast %33 : vector<1xf32> to vector<1x1x1xf32>
    %35 = vector.extract %34[0, 0, 0] : f32 from vector<1x1x1xf32>
    %cst_18 = arith.constant 0.000000e+00 : f32
    %36 = vector.broadcast %cst_18 : f32 to vector<1x1x8x128xf32>
    %37 = vector.broadcast %35 : f32 to vector<1x1x8x128xf32>
    %38 = arith.addf %36, %37 : vector<1x1x8x128xf32>
    %c0_19 = arith.constant 0 : index
    %c0_20 = arith.constant 0 : index
    %c0_21 = arith.constant 0 : index
    %c0_22 = arith.constant 0 : index
    %39 = vector.load %arg3[%c0_19, %c0_20, %c0_21, %c0_22] : memref<1x1x8x128xf32, #tpu.memory_space<vmem>>, vector<1x1x8x128xf32>
    tpu.vector_store %arg3[%c0_19, %c0_20, %c0_21, %c0_22], %38 {strides = array<i32>} : memref<1x1x8x128xf32, #tpu.memory_space<vmem>>, vector<1x1x8x128xf32>,
    return
  }
  func.func @transform_0(%arg0: i32, %arg1: i32) -> (i32, i32, i32, i32) {
    %c0_i32 = arith.constant 0 : i32
    %c0_i32_0 = arith.constant 0 : i32
    %c0_i32_1 = arith.constant 0 : i32
    return %arg0, %c0_i32, %arg1, %c0_i32_0 : i32, i32, i32, i32
  }
  func.func @transform_1(%arg0: i32, %arg1: i32) -> (i32, i32, i32, i32) {
    %c0_i32 = arith.constant 0 : i32
    %c0_i32_0 = arith.constant 0 : i32
    %c0_i32_1 = arith.constant 0 : i32
    return %arg0, %arg1, %c0_i32, %c0_i32_0 : i32, i32, i32, i32
  }
}

</mosaic_0001>

<bundles_post_ra>
// kernel: tpu_custom_call.1
= control target key start
LH: loop header
LB: loop body
LE: loop exit
PB: predicated region body
PF: predicated region fallthrough
CT: control target
= control target key end

     0   :  { %6 = vsyncpa [#allocation3], 0  ;;  %s415_s0 = inlined_call_operand.hbm [shape: f32[2,4,16,16], index: 0, kind: input, shape index: {}]   ;;  %s416_s1 = inlined_call_operand.hbm [shape: f32[1,1,8,128], index: 1, kind: output, shape index: {}]  }
   0x1   :  { %7 = vsyncpa [#allocation4], 0  ;;  %s340_s6 = smov [#allocation2]   ;;  %s292_s10 = scalar_lea.hbm %s415_s0, 2048 }
   0x2   :  { %s13_s7 = sshll.u32 %s340_s6, 4  ;;  %p293_p0 = scmp.ne.s32.totalorder %s415_s0, %s292_s10  ;;  %s14_s7 = int_to_ptr.vmem [resolvable:$true] %s13_s7 }
   0x3   :  { %p296_p1 = scmp.lt.u32.totalorder %s292_s10, %s415_s0 }
   0x5   :  { %p298_p2 = pnand %p296_p1, %p293_p0 }
   0x7   :  { %301 = shalt.err (!%p298_p2)
}
   0x8   :  { %s302_s15 = scalar_lea.vmem %s14_s7, 2048  ;;  %p307_p4 = scmp.lt.s32.totalorder %s14_s7, %s14_s7 }
   0x9   :  { %p303_p3 = scmp.ne.s32.totalorder %s14_s7, %s302_s15  ;;  %p308_p5 = scmp.lt.s32.totalorder %s302_s15, %s302_s15 }
   0xb   :  { %p309_p6 = por %p308_p5, %p307_p4 }
   0xd   :  { %p310_p7 = pnand %p309_p6, %p303_p3 }
   0xf   :  { %313 = shalt.err (!%p310_p7)
}
  0x10   :  { %s341_s16 = smov 128   ;;  %s342_s17 = smov 8  }
  0x11   :  { %19 = dma.hbm_to_vmem [thread:$0]  %s415_s0, 2048, %s14_s7, [#allocation3], %s341_s16, %s341_s16, %s342_s17  }
  0x12   :  { %336 = dma.done.wait [#allocation3], 2048  }
  0x13   :  { %337 = vsyncadd [#allocation3], 4294965248  ;;  %v123_v0 = vlaneseq  ;;  %v343_v1 = vmov 0.0|0.0   ;;  %vm344_vm0 = vmmov 0   ;;  %v345_v4 = vmov 0.0   ;;  %v23_v11 = vld [vmem:[#allocation2] sm:$0xff] }
  0x14   :  { %279 = vmatprep.subr.bf16.mxu0 %v343_v1  ;;  %276 = vmatprep.mubr.msk.f32.mxu0 %vm344_vm0, %v345_v4  ;;  %v24_v12 = vld [vmem:[#allocation2 + $0x8] sm:$0xff]  ;;  %v25_v13 = vld [vmem:[#allocation2 + $0x40] sm:$0xff]  ;;  %v28_v17 = vld [vmem:[#allocation2 + $0x10] sm:$0xff]  ;;  %v346_v31 = vmov 0.015625|0.015625   ;;  %vm66_vm8 = vcmask 125952  }
  0x15   :  { %v124_v2 = vshrl.u32 %v123_v0, 7  ;;  %v127_v3 = vand.u32 127, %v123_v0  ;;  %v26_v16 = vld [vmem:[#allocation2 + $0x48] sm:$0xff]  ;;  %v29_v18 = vld [vmem:[#allocation2 + $0x18] sm:$0xff]  ;;  %v30_v19 = vld [vmem:[#allocation2 + $0x50] sm:$0xff]  ;;  %v32_v21 = vadd.f32 %v28_v17, %v23_v11  ;;  %vm147_vm9 = vcmask 1041409  }
  0x16   :  { %v31_v20 = vld [vmem:[#allocation2 + $0x58] sm:$0xff]  ;;  %v33_v22 = vadd.f32 %v29_v18, %v24_v12  ;;  %v34_v23 = vadd.f32 %v30_v19, %v25_v13  ;;  %v37_v25 = vld [vmem:[#allocation2 + $0x20] sm:$0xff]  ;;  %v38_v26 = vld [vmem:[#allocation2 + $0x28] sm:$0xff]  ;;  %vm149_vm10 = vcmask 1042434   ;;  %vm151_vm11 = vcmask 1043459   ;;  %s347_s0 = smov [#allocation5]  }
  0x17   :  { %v125_v5 = vadd.s32 8, %v124_v2  ;;  %v128_v6 = vmul.u32 4, %v127_v3  ;;  %v131_v7 = vadd.s32 1, %v127_v3  ;;  %v35_v24 = vadd.f32 %v31_v20, %v26_v16  ;;  %v39_v27 = vld [vmem:[#allocation2 + $0x60] sm:$0xff]  ;;  %v40_v28 = vld [vmem:[#allocation2 + $0x68] sm:$0xff]  ;;  %v46_v34 = vld [vmem:[#allocation2 + $0x30] sm:$0xff] }
  0x18   :  { %v41_v29 = vadd.f32 %v37_v25, %v32_v21  ;;  %v42_v30 = vadd.f32 %v38_v26, %v33_v22  ;;  %v43_v32 = vadd.f32 %v39_v27, %v34_v23  ;;  %v47_v35 = vld [vmem:[#allocation2 + $0x38] sm:$0xff]  ;;  %v48_v36 = vld [vmem:[#allocation2 + $0x70] sm:$0xff]  ;;  %vm153_vm12 = vcmask 1044484   ;;  %s256_s20 = sshll.u32 %s347_s0, 4  ;;  %s257_s20 = int_to_ptr.vmem [resolvable:$true] %s256_s20 }
  0x19   :  { %vm370_vm1 = vcmp.ge.s32.totalorder %v124_v2, %v128_v6  ;;  %v132_v9 = vmul.u32 4, %v131_v7  ;;  %vm374_vm2 = vcmp.ge.s32.totalorder %v125_v5, %v128_v6  ;;  %v44_v33 = vadd.f32 %v40_v28, %v35_v24  ;;  %v49_v37 = vld [vmem:[#allocation2 + $0x78] sm:$0xff]  ;;  %s314_s22 = scalar_lea.vmem %s257_s20, 128  ;;  %p319_p9 = scmp.lt.s32.totalorder %s257_s20, %s257_s20 }
  0x1a   :  { %v50_v38 = vadd.f32 %v46_v34, %v41_v29  ;;  %v51_v39 = vadd.f32 %v47_v35, %v42_v30  ;;  %v52_v40 = vadd.f32 %v48_v36, %v43_v32  ;;  %vm155_vm13 = vcmask 1045509   ;;  %p315_p8 = scmp.ne.s32.totalorder %s257_s20, %s314_s22  ;;  %p320_p10 = scmp.lt.s32.totalorder %s314_s22, %s314_s22 }
  0x1b   :  { %vm378_vm3 = vcmp.lt.s32.totalorder %v124_v2, %v132_v9  ;;  %vm382_vm4 = vcmp.lt.s32.totalorder %v125_v5, %v132_v9  ;;  %v53_v41 = vadd.f32 %v49_v37, %v44_v33  ;;  %vm157_vm14 = vcmask 1046534  }
  0x1c   :  { %vm135_vm5 = vmand %vm370_vm1, %vm378_vm3  ;;  %v58_v42 = vcombine.high %v50_v38, %v50_v38  ;;  %v59_v43 = vcombine.high %v51_v39, %v51_v39  ;;  %v67_v44 = vsel %vm66_vm8, %v50_v38, 0.0  ;;  %v81_v45 = vsel %vm66_vm8, %v51_v39, 0.0  ;;  %p321_p11 = por %p320_p10, %p319_p9 }
  0x1d   :  { %vm136_vm6 = vmand %vm374_vm2, %vm382_vm4  ;;  %v60_v46 = vcombine.high %v52_v40, %v52_v40  ;;  %v61_v47 = vcombine.high %v53_v41, %v53_v41  ;;  %v68_v48 = vrot.slane %v67_v44, 4  ;;  %v82_v49 = vrot.slane %v81_v45, 4 }
  0x1e   :  { %vm280_vm7 = vmpackc.low %vm136_vm6, %vm135_vm5  ;;  %v74_v50 = vsel %vm66_vm8, %v58_v42, 0.0  ;;  %v88_v51 = vsel %vm66_vm8, %v59_v43, 0.0  ;;  %v95_v52 = vsel %vm66_vm8, %v52_v40, 0.0  ;;  %v109_v53 = vsel %vm66_vm8, %v53_v41, 0.0  ;;  %p322_p12 = pnand %p321_p11, %p315_p8 }
  0x1f   :  { %281 = vmatpush3.bf16.msk.msra.mxu0 %vm280_vm7, %v346_v31  ;;  %v69_v54 = vadd.f32 %v68_v48, %v67_v44  ;;  %v75_v55 = vrot.slane %v74_v50, 4  ;;  %v83_v56 = vadd.f32 %v82_v49, %v81_v45  ;;  %v89_v57 = vrot.slane %v88_v51, 4 }
  0x20   :  { %v96_v58 = vrot.slane %v95_v52, 4  ;;  %v102_v59 = vsel %vm66_vm8, %v60_v46, 0.0  ;;  %v110_v60 = vrot.slane %v109_v53, 4  ;;  %v116_v61 = vsel %vm66_vm8, %v61_v47, 0.0 }
  0x21   :  { %v70_v62 = vrot.slane %v69_v54, 2  ;;  %v76_v63 = vadd.f32 %v75_v55, %v74_v50  ;;  %v84_v0 = vrot.slane %v83_v56, 2  ;;  %v90_v1 = vadd.f32 %v89_v57, %v88_v51 }
  0x22   :  { %v97_v2 = vadd.f32 %v96_v58, %v95_v52  ;;  %v103_v3 = vrot.slane %v102_v59, 4  ;;  %v111_v4 = vadd.f32 %v110_v60, %v109_v53  ;;  %v117_v5 = vrot.slane %v116_v61, 4 }
  0x23   :  { %v71_v6 = vadd.f32 %v70_v62, %v69_v54  ;;  %v77_v7 = vrot.slane %v76_v63, 2  ;;  %v85_v8 = vadd.f32 %v84_v0, %v83_v56  ;;  %v91_v9 = vrot.slane %v90_v1, 2 }
  0x24   :  { %v98_v10 = vrot.slane %v97_v2, 2  ;;  %v104_v11 = vadd.f32 %v103_v3, %v102_v59  ;;  %v112_v12 = vrot.slane %v111_v4, 2  ;;  %v118_v13 = vadd.f32 %v117_v5, %v116_v61 }
  0x25   :  { %v72_v14 = vrot.slane %v71_v6, 1  ;;  %v78_v15 = vadd.f32 %v77_v7, %v76_v63  ;;  %v86_v16 = vrot.slane %v85_v8, 1  ;;  %v92_v17 = vadd.f32 %v91_v9, %v90_v1 }
  0x26   :  { %v99_v18 = vadd.f32 %v98_v10, %v97_v2  ;;  %v105_v19 = vrot.slane %v104_v11, 2  ;;  %v113_v20 = vadd.f32 %v112_v12, %v111_v4  ;;  %v119_v21 = vrot.slane %v118_v13, 2 }
  0x27   :  { %v73_v22 = vadd.f32 %v72_v14, %v71_v6  ;;  %v79_v23 = vrot.slane %v78_v15, 1  ;;  %v87_v24 = vadd.f32 %v86_v16, %v85_v8  ;;  %v93_v25 = vrot.slane %v92_v17, 1 }
  0x28   :  { %v100_v26 = vrot.slane %v99_v18, 1  ;;  %v106_v27 = vadd.f32 %v105_v19, %v104_v11  ;;  %v114_v28 = vrot.slane %v113_v20, 1  ;;  %v120_v29 = vadd.f32 %v119_v21, %v118_v13 }
  0x29   :  { %v80_v30 = vadd.f32 %v79_v23, %v78_v15  ;;  %v94_v31 = vadd.f32 %v93_v25, %v92_v17  ;;  %vm159_vm15 = vcmask 1047559   ;;  %vm161_vm0 = vcmask 130048  }
  0x2a   :  { %v101_v32 = vadd.f32 %v100_v26, %v99_v18  ;;  %v107_v33 = vrot.slane %v106_v27, 1  ;;  %v121_v34 = vrot.slane %v120_v29, 1  ;;  %v115_v37 = vadd.f32 %v114_v28, %v113_v20 }
  0x2b   :  { %v148_v35 = vsel %vm147_vm9, %v80_v30, %v73_v22  ;;  %vm236_vm1 = vcmask 31744  }
  0x2c   :  { %v108_v36 = vadd.f32 %v107_v33, %v106_v27  ;;  %v150_v38 = vsel %vm149_vm10, %v87_v24, %v148_v35  ;;  %v122_v39 = vadd.f32 %v121_v34, %v120_v29 }
  0x2d   :  { %v152_v40 = vsel %vm151_vm11, %v94_v31, %v150_v38 }
  0x2e   :  { %v154_v41 = vsel %vm153_vm12, %v101_v32, %v152_v40 }
  0x2f   :  { %v156_v42 = vsel %vm155_vm13, %v108_v36, %v154_v41 }
  0x30   :  { %v158_v43 = vsel %vm157_vm14, %v115_v37, %v156_v42 }
  0x31   :  { %v160_v44 = vsel %vm159_vm15, %v122_v39, %v158_v43 }
  0x32   :  { %277 = vmatmul.mubr.msk.f32.vlgmr.msra.gmra.mrb[0].mxu0 %vm161_vm0, %v160_v44 }
 0x105   :  { %v230_v45 = vpop.f32.mrb[0].mxu0 }
 0x106   :  { %v268_v46 = vadd.f32 -0.6, %v230_v45  ;;  %v278_v47 = vpop.f32.mrb[1].mxu0 }
 0x108   :  { %v235_v48 = vmul.f32 %v268_v46, %v268_v46 }
 0x10a   :  { %v237_v49 = vsel %vm236_vm1, %v235_v48, 0.0 }
 0x10b   :  { %238 = vadd.xlane.f32.xlu0 %v237_v49 }
 0x198   :  { %v239_v50 = vpop.xlane.xlu0 %238 }
 0x199   :  { %v240_v51 = vrot.slane %v239_v50, 4 }
 0x19b   :  { %v241_v52 = vadd.f32 %v240_v51, %v239_v50 }
 0x19d   :  { %v242_v53 = vrot.slane %v241_v52, 2 }
 0x19f   :  { %v243_v54 = vadd.f32 %v242_v53, %v241_v52 }
 0x1a1   :  { %v244_v55 = vrot.slane %v243_v54, 1 }
 0x1a3   :  { %v245_v56 = vadd.f32 %v244_v55, %v243_v54 }
 0x1a5   :  { %282 = vpush %v245_v56 }
 0x1d6   :  { %s283_s21 = spop %282 }
 0x1d7   :  { %v247_v57 = vstv %s283_s21 }
 0x1d8   :  { %249 = vst [vmem:[#allocation5] sm:$0xff] %v247_v57 }
 0x1d9   :  { %325 = shalt.err (!%p322_p12)
}
 0x1da   :  { %s326_s25 = scalar_lea.hbm %s416_s1, 128 }
 0x1db   :  { %p327_p13 = scmp.ne.s32.totalorder %s416_s1, %s326_s25  ;;  %p330_p0 = scmp.lt.u32.totalorder %s326_s25, %s416_s1 }
 0x1dd   :  { %p332_p1 = pnand %p330_p0, %p327_p13 }
 0x1df   :  { %335 = shalt.err (!%p332_p1)
}
 0x1e0   :  { %259 = dma.vmem_to_hbm [thread:$0]  %s257_s20, 128, %s416_s1, [#allocation4]  }
 0x1e1   :  { %338 = dma.done.wait [#allocation4], 128  }
 0x1e2   :  { %339 = vsyncadd [#allocation4], 4294967168 }
 0x1e3   :  { %263 = vsyncpa [#allocation3], 1 }
 0x1e4   :  { %264 = vsyncpa [#allocation4], 1 }

</bundles_post_ra>
